<compile_context>
chip_gen: v7x
topology: tpu7x:2x2x1
jax: 0.10.0
libtpu: 0.0.40
codegen_flags: <defaults>
</compile_context>

<pallas_src>
import functools
import math

import numpy as np
import jax
import jax.numpy as jnp
from jax import lax
from jax.experimental import pallas as pl
from jax.experimental.pallas import tpu as pltpu


# ----------------------------- compiler params -----------------------------


def _vmem_limit_bytes():
    cap = 64 * 1024 * 1024  # conservative fallback (v7x physical VMEM per TC)
    try:
        info = pltpu.get_tpu_info()
        cap = int(getattr(info, "vmem_capacity_bytes", cap))
    except Exception:
        pass
    # leave headroom for double-buffering / compiler scratch; never exceed 64 MiB.
    return min(int(cap * 3 // 4), 64 * 1024 * 1024)


_VMEM_LIMIT = _vmem_limit_bytes()


def _cp(*sem):
    return pltpu.CompilerParams(
        dimension_semantics=sem if sem else None,
        vmem_limit_bytes=_VMEM_LIMIT)


def _round_up(v, m):
    return (v + m - 1) // m * m


def _pick_k(K):
    """Reduction-axis tiling: K padded to a multiple of 128, TK <= 2048, TK | Kp."""
    Kp = _round_up(K, 128)
    nk = -(-Kp // 2048)
    TK = _round_up(-(-Kp // nk), 128)
    return TK, TK * nk


def _pick_m(M):
    """Row tiling: TM up to 512, multiple of 8, TM | Mp."""
    Mp = _round_up(max(M, 8), 8)
    if Mp <= 512:
        return Mp, Mp
    nm = -(-Mp // 512)
    TM = _round_up(-(-Mp // nm), 8)
    return TM, TM * nm


# ----------------------------- Pallas kernels -----------------------------


def _mm_kernel(x_ref, w_ref, b_ref, o_ref, acc_ref, *, relu):
    # Tiled GEMM: grid = (M_tiles, N_tiles, K_tiles); K is the reduction axis.
    k = pl.program_id(2)

    @pl.when(k == 0)
    def _():
        acc_ref[...] = jnp.zeros_like(acc_ref)

    acc_ref[...] += jnp.dot(x_ref[...], w_ref[...],
                            preferred_element_type=jnp.float32)

    @pl.when(k == pl.num_programs(2) - 1)
    def _():
        r = acc_ref[...] + b_ref[...]
        if relu:
            r = jnp.maximum(r, 0.0)
        o_ref[...] = r.astype(o_ref.dtype)


def _mm_res_kernel(x_ref, w_ref, b_ref, res_ref, o_ref, acc_ref, *, relu):
    # Same as _mm_kernel, with the residual add fused into the epilogue.
    k = pl.program_id(2)

    @pl.when(k == 0)
    def _():
        acc_ref[...] = jnp.zeros_like(acc_ref)

    acc_ref[...] += jnp.dot(x_ref[...], w_ref[...],
                            preferred_element_type=jnp.float32)

    @pl.when(k == pl.num_programs(2) - 1)
    def _():
        r = acc_ref[...] + b_ref[...] + res_ref[...].astype(jnp.float32)
        if relu:
            r = jnp.maximum(r, 0.0)
        o_ref[...] = r.astype(o_ref.dtype)


def _mm_simple_kernel(x_ref, w_ref, b_ref, o_ref, *, relu):
    # Single K tile: no accumulator scratch, write the epilogue straight out.
    r = jnp.dot(x_ref[...], w_ref[...], preferred_element_type=jnp.float32) + b_ref[...]
    if relu:
        r = jnp.maximum(r, 0.0)
    o_ref[...] = r.astype(o_ref.dtype)


def _mm_res_simple_kernel(x_ref, w_ref, b_ref, res_ref, o_ref, *, relu):
    r = (jnp.dot(x_ref[...], w_ref[...], preferred_element_type=jnp.float32)
         + b_ref[...] + res_ref[...].astype(jnp.float32))
    if relu:
        r = jnp.maximum(r, 0.0)
    o_ref[...] = r.astype(o_ref.dtype)


def _one_minus_sigmoid_kernel(a_ref, o_ref):
    o_ref[...] = (1.0 - jax.nn.sigmoid(a_ref[...].astype(jnp.float32))).astype(o_ref.dtype)


def _ca_kernel(x_ref, res_ref, w1_ref, b1_ref, w2_ref, b2_ref, o_ref):
    # Fused CALayer (+ RCAB residual) for one batch element:
    #   y = sigmoid(conv1x1(relu(conv1x1(avg_pool(x))))) ; out = x * y + residual
    x = x_ref[...].astype(jnp.float32)                    # (1, HW, C)
    y = jnp.mean(x, axis=1)                               # (1, C)
    y1 = jnp.dot(y, w1_ref[...], preferred_element_type=jnp.float32) + b1_ref[...]
    y1 = jnp.maximum(y1, 0.0)                             # (1, Cr)
    y2 = jnp.dot(y1, w2_ref[...], preferred_element_type=jnp.float32) + b2_ref[...]
    y2 = jax.nn.sigmoid(y2)                               # (1, C)
    o_ref[...] = (x * y2[:, None, :]
                  + res_ref[...].astype(jnp.float32)).astype(o_ref.dtype)


def _ha_kernel(soft_ref, att_ref, x_ref, o_ref):
    # Holistic attention: per-image min-max norm of blurred attention,
    # elementwise max with raw attention, channel-broadcast multiply.
    # Tiled over channels; the (tiny) soft/att maps are re-read per channel tile.
    s = soft_ref[...].astype(jnp.float32)                 # (1, HW, 1)
    a = att_ref[...].astype(jnp.float32)                  # (1, HW, 1)
    mx = jnp.max(s)
    mn = jnp.min(s)
    s = (s - mn) / (mx - mn + 1e-8)
    w = jnp.maximum(s, a)
    o_ref[...] = (x_ref[...].astype(jnp.float32) * w).astype(o_ref.dtype)


# ----------------------------- Pallas GEMM wrapper -----------------------------


def _matmul_packed(patches, w, b, res, *, K, Kp, N, Np, relu):
    """act(patches @ w + b [+ res]) with pre-packed (Kp, Np) bf16 weights.

    patches: (M, K) bf16.  Output: (M, Np) bf16 (caller slices channels to N).
    """
    M = patches.shape[0]
    TK, _ = _pick_k(K)
    TM, Mp = _pick_m(M)
    TN = 256 if Np >= 512 else Np

    xb = patches
    if patches.shape[1] != Kp or Mp != M:
        xb = jnp.pad(patches, ((0, Mp - M), (0, Kp - patches.shape[1])))
    b2 = b.reshape(1, Np)

    gm, gn, gk = Mp // TM, Np // TN, Kp // TK
    out_shape = jax.ShapeDtypeStruct((Mp, Np), jnp.bfloat16)

    if res is not None and Mp != M:
        res = jnp.pad(res, ((0, Mp - M), (0, 0)))

    if gk == 1:
        x_spec = pl.BlockSpec((TM, TK), lambda i, j: (i, 0))
        w_spec = pl.BlockSpec((TK, TN), lambda i, j: (0, j))
        b_spec = pl.BlockSpec((1, TN), lambda i, j: (0, j))
        o_spec = pl.BlockSpec((TM, TN), lambda i, j: (i, j))
        r_spec = pl.BlockSpec((TM, TN), lambda i, j: (i, j))
        cp = _cp("parallel", "parallel")
        if res is None:
            out = pl.pallas_call(
                functools.partial(_mm_simple_kernel, relu=relu),
                out_shape=out_shape, grid=(gm, gn),
                in_specs=[x_spec, w_spec, b_spec], out_specs=o_spec,
                compiler_params=cp)(xb, w, b2)
        else:
            out = pl.pallas_call(
                functools.partial(_mm_res_simple_kernel, relu=relu),
                out_shape=out_shape, grid=(gm, gn),
                in_specs=[x_spec, w_spec, b_spec, r_spec], out_specs=o_spec,
                compiler_params=cp)(xb, w, b2, res)
    else:
        x_spec = pl.BlockSpec((TM, TK), lambda i, j, k: (i, k))
        w_spec = pl.BlockSpec((TK, TN), lambda i, j, k: (k, j))
        b_spec = pl.BlockSpec((1, TN), lambda i, j, k: (0, j))
        o_spec = pl.BlockSpec((TM, TN), lambda i, j, k: (i, j))
        r_spec = pl.BlockSpec((TM, TN), lambda i, j, k: (i, j))
        scratch = [pltpu.VMEM((TM, TN), jnp.float32)]
        cp = _cp("parallel", "parallel", "arbitrary")
        if res is None:
            out = pl.pallas_call(
                functools.partial(_mm_kernel, relu=relu),
                out_shape=out_shape, grid=(gm, gn, gk),
                in_specs=[x_spec, w_spec, b_spec], out_specs=o_spec,
                scratch_shapes=scratch, compiler_params=cp)(xb, w, b2)
        else:
            out = pl.pallas_call(
                functools.partial(_mm_res_kernel, relu=relu),
                out_shape=out_shape, grid=(gm, gn, gk),
                in_specs=[x_spec, w_spec, b_spec, r_spec], out_specs=o_spec,
                scratch_shapes=scratch, compiler_params=cp)(xb, w, b2, res)

    return out[:M] if Mp != M else out


# ----------------------------- conv glue + Pallas GEMM -----------------------------


def _im2col(x, KH, KW, stride, padding, dilation):
    # Patch buffer built from KH*KW strided slices + concat (no gather), in bf16.
    # TODO(synk): replace with tap-accumulated direct conv to kill the HBM bounce.
    N, H, W, Cin = x.shape
    ph, pw = padding
    Ho = (H + 2 * ph - dilation * (KH - 1) - 1) // stride + 1
    Wo = (W + 2 * pw - dilation * (KW - 1) - 1) // stride + 1
    xp = jnp.pad(x, ((0, 0), (ph, ph), (pw, pw), (0, 0)))
    cols = []
    for i in range(KH):
        for j in range(KW):
            r0 = i * dilation
            c0 = j * dilation
            cols.append(xp[:, r0:r0 + (Ho - 1) * stride + 1:stride,
                           c0:c0 + (Wo - 1) * stride + 1:stride, :])
    patches = jnp.concatenate(cols, axis=-1)
    return patches.reshape(N * Ho * Wo, KH * KW * Cin), Ho, Wo


@functools.partial(jax.jit, static_argnames=(
    "kh", "kw", "cin", "K", "Kp", "N", "Np", "stride", "padding", "dilation", "relu"))
def _conv2d_jit(x, w, b, residual, *, kh, kw, cin, K, Kp, N, Np,
                stride, padding, dilation, relu):
    Nb, H, W, _ = x.shape
    x = x.astype(jnp.bfloat16)
    if kh == 1 and kw == 1 and padding == (0, 0):
        xs = x if stride == 1 else x[:, ::stride, ::stride, :]
        Ho, Wo = xs.shape[1], xs.shape[2]
        patches = xs.reshape(Nb * Ho * Wo, cin)
    else:
        patches, Ho, Wo = _im2col(x, kh, kw, stride, padding, dilation)
    res = None
    if residual is not None:
        res = residual.astype(jnp.bfloat16).reshape(Nb * Ho * Wo, -1)
        if Np != N:
            res = jnp.pad(res, ((0, 0), (0, Np - N)))
    out = _matmul_packed(patches, w, b, res, K=K, Kp=Kp, N=N, Np=Np, relu=relu)
    out = out.reshape(Nb, Ho, Wo, Np)
    return out[..., :N] if Np != N else out


def apply_conv(x, pk, residual=None, *, stride=1, padding=0, dilation=1, relu=False):
    if isinstance(padding, int):
        padding = (padding, padding)
    return _conv2d_jit(x, pk['w'], pk['b'], residual,
                       kh=pk['kh'], kw=pk['kw'], cin=pk['cin'],
                       K=pk['K'], Kp=pk['Kp'], N=pk['N'], Np=pk['Np'],
                       stride=stride, padding=padding, dilation=dilation, relu=relu)


@functools.partial(jax.jit, static_argnames=("dilations", "cin", "K", "Kp", "N", "Np"))
def _classifier_jit(x, w, b, *, dilations, cin, K, Kp, N, Np):
    # Classifier_Module: sum of 4 dilated 3x3 convs == ONE GEMM with K-concatenated
    # patches against the pre-concatenated (K, Np) weight and pre-summed bias.
    Nb, H, W, _ = x.shape
    xb = x.astype(jnp.bfloat16)
    patch_list = []
    Ho = Wo = None
    for d in dilations:
        p, Ho, Wo = _im2col(xb, 3, 3, 1, (d, d), d)
        patch_list.append(p)
    patches = jnp.concatenate(patch_list, axis=1)
    out = _matmul_packed(patches, w, b, None, K=K, Kp=Kp, N=N, Np=Np, relu=False)
    out = out.reshape(Nb, Ho, Wo, Np)
    return out[..., :N] if Np != N else out


def apply_classifier(x, pk):
    return _classifier_jit(x, pk['w'], pk['b'], dilations=pk['dil'], cin=pk['cin'],
                           K=pk['K'], Kp=pk['Kp'], N=pk['N'], Np=pk['Np'])


# ----------------------------- fused elementwise kernels -----------------------------


@jax.jit
def _ca_apply(x3, res3, w1, b1, w2, b2):
    Nb, HW, C = x3.shape
    Cr = w1.shape[1]
    return pl.pallas_call(
        _ca_kernel,
        out_shape=jax.ShapeDtypeStruct((Nb, HW, C), jnp.bfloat16),
        grid=(Nb,),
        in_specs=[pl.BlockSpec((1, HW, C), lambda n: (n, 0, 0)),
                  pl.BlockSpec((1, HW, C), lambda n: (n, 0, 0)),
                  pl.BlockSpec((C, Cr), lambda n: (0, 0)),
                  pl.BlockSpec((1, Cr), lambda n: (0, 0)),
                  pl.BlockSpec((Cr, C), lambda n: (0, 0)),
                  pl.BlockSpec((1, C), lambda n: (0, 0))],
        out_specs=pl.BlockSpec((1, HW, C), lambda n: (n, 0, 0)),
        compiler_params=_cp("parallel"),
    )(x3, res3, w1, b1.reshape(1, Cr), w2, b2.reshape(1, C))


@jax.jit
def _ha_apply(soft, att, x):
    Nb, HW, C = x.shape
    TC = 128 if C % 128 == 0 else C
    return pl.pallas_call(
        _ha_kernel,
        out_shape=jax.ShapeDtypeStruct((Nb, HW, C), jnp.bfloat16),
        grid=(Nb, C // TC),
        in_specs=[pl.BlockSpec((1, HW, 1), lambda n, c: (n, 0, 0)),
                  pl.BlockSpec((1, HW, 1), lambda n, c: (n, 0, 0)),
                  pl.BlockSpec((1, HW, TC), lambda n, c: (n, 0, c))],
        out_specs=pl.BlockSpec((1, HW, TC), lambda n, c: (n, 0, c)),
        compiler_params=_cp("parallel", "parallel"),
    )(soft, att, x)


@jax.jit
def _one_minus_sigmoid(x):
    shape = x.shape
    total = x.size
    # lane-dense 2-D view (last dim multiple of 128) when possible
    flat = x.reshape(total // 128, 128) if total % 128 == 0 else x.reshape(-1, shape[-1])
    out = pl.pallas_call(
        _one_minus_sigmoid_kernel,
        out_shape=jax.ShapeDtypeStruct(flat.shape, x.dtype),
        compiler_params=_cp(),
    )(flat)
    return out.reshape(shape)


# ----------------------------- glue (plain JAX) -----------------------------


@functools.partial(jax.jit, static_argnames=("out_h", "out_w"))
def upsample_bilinear(x, *, out_h, out_w):
    # bilinear with align_corners=True, matching nn.Upsample(..., align_corners=True)
    # TODO(synk): interpolation kept in plain JAX (gather + lerp glue), not Pallas.
    N, H, W, C = x.shape
    xf = x.astype(jnp.float32)
    ys = jnp.linspace(0.0, H - 1.0, out_h)
    xs = jnp.linspace(0.0, W - 1.0, out_w)
    y0 = jnp.floor(ys).astype(jnp.int32)
    x0 = jnp.floor(xs).astype(jnp.int32)
    y1 = jnp.minimum(y0 + 1, H - 1)
    x1 = jnp.minimum(x0 + 1, W - 1)
    wy = (ys - y0.astype(jnp.float32))[None, :, None, None]
    wx = (xs - x0.astype(jnp.float32))[None, None, :, None]
    g = lambda yi, xi: xf[:, yi][:, :, xi]
    top = g(y0, x0) * (1.0 - wx) + g(y0, x1) * wx
    bot = g(y1, x0) * (1.0 - wx) + g(y1, x1) * wx
    return (top * (1.0 - wy) + bot * wy).astype(x.dtype)


def _up(x, factor):
    return upsample_bilinear(x, out_h=x.shape[1] * factor, out_w=x.shape[2] * factor)


def maxpool_3x3_s2_p1(x):
    # TODO(synk): max-pool done with lax.reduce_window (glue); negligible compute.
    return lax.reduce_window(x, -jnp.inf, lax.max, (1, 3, 3, 1), (1, 2, 2, 1),
                             ((0, 0), (1, 1), (1, 1), (0, 0)))


# ----------------------------- parameters (pre-packed) -----------------------------


class ParamGen:
    def __init__(self, seed=0):
        self.rng = np.random.default_rng(seed)

    def conv_np(self, kh, kw, cin, cout, std=None):
        if std is None:
            std = 1.0 / math.sqrt(kh * kw * cin)
        w = self.rng.normal(0.0, std, size=(kh, kw, cin, cout)).astype(np.float32)
        return w, np.zeros((cout,), np.float32)


def _pack_matrix(w2d, b_np, *, kh, kw, cin):
    # Pre-pack once: bf16, K padded to the GEMM tiling, Cout padded to >=128 lanes.
    K, Cout = w2d.shape
    _, Kp = _pick_k(K)
    Np = max(_round_up(Cout, 128), 128)
    wp = np.zeros((Kp, Np), np.float32)
    wp[:K, :Cout] = w2d
    bp = np.zeros((Np,), np.float32)
    bp[:Cout] = b_np
    return {'w': jnp.asarray(wp, jnp.bfloat16), 'b': jnp.asarray(bp),
            'kh': kh, 'kw': kw, 'cin': cin, 'K': K, 'Kp': Kp, 'N': Cout, 'Np': Np}


def _pack_conv(w_np, b_np):
    KH, KW, Cin, Cout = w_np.shape
    return _pack_matrix(w_np.reshape(KH * KW * Cin, Cout), b_np, kh=KH, kw=KW, cin=Cin)


def make_bottleneck(pg, inplanes, planes, stride, downsample):
    p = {'c1': _pack_conv(*pg.conv_np(1, 1, inplanes, planes)),
         'c2': _pack_conv(*pg.conv_np(3, 3, planes, planes)),
         'c3': _pack_conv(*pg.conv_np(1, 1, planes, planes * 4)),
         'stride': stride}
    if downsample:
        p['ds'] = _pack_conv(*pg.conv_np(1, 1, inplanes, planes * 4))
    return p


def make_layer(pg, inplanes, planes, blocks, stride):
    ds = (stride != 1) or (inplanes != planes * 4)
    layer = [make_bottleneck(pg, inplanes, planes, stride, ds)]
    inplanes = planes * 4
    for _ in range(blocks - 1):
        layer.append(make_bottleneck(pg, inplanes, planes, 1, False))
    return layer, inplanes


def make_classifier(pg, dilations, nolabels, cin):
    # Classifier_Module: 4 dilated 3x3 convs (weights ~ N(0, 0.01), biases 0).
    # Weights pre-concatenated along K, biases pre-summed -> one GEMM per call.
    ws, bs = [], []
    for _ in dilations:
        w, b = pg.conv_np(3, 3, cin, nolabels, std=0.01)
        ws.append(w.reshape(9 * cin, nolabels))
        bs.append(b)
    pk = _pack_matrix(np.concatenate(ws, axis=0), np.sum(np.stack(bs), axis=0),
                      kh=3, kw=3, cin=cin)
    pk['dil'] = tuple(int(d) for d in dilations)
    return pk


def make_ca(pg, channel, reduction=16):
    cr = channel // reduction
    w1, b1 = pg.conv_np(1, 1, channel, cr)
    w2, b2 = pg.conv_np(1, 1, cr, channel)
    return {'w1': jnp.asarray(w1.reshape(channel, cr)), 'b1': jnp.asarray(b1),
            'w2': jnp.asarray(w2.reshape(cr, channel)), 'b2': jnp.asarray(b2)}


def make_rcab(pg, n_feat):
    return {'conv1': _pack_conv(*pg.conv_np(3, 3, n_feat, n_feat)),
            'conv2': _pack_conv(*pg.conv_np(3, 3, n_feat, n_feat)),
            'ca': make_ca(pg, n_feat, 16)}


def make_fix_dec(pg, ch):
    return {'conv4': make_classifier(pg, [3, 6, 12, 18], ch, 2048),
            'conv3': make_classifier(pg, [3, 6, 12, 18], ch, 1024),
            'conv2': make_classifier(pg, [3, 6, 12, 18], ch, 512),
            'conv1': make_classifier(pg, [3, 6, 12, 18], ch, 256),
            'racb4': make_rcab(pg, ch * 4),
            'cls': make_classifier(pg, [6, 12, 18, 24], 1, ch * 4)}


def make_sal_dec(pg, ch):
    return {'conv4': make_classifier(pg, [3, 6, 12, 18], ch, 2048),
            'conv3': make_classifier(pg, [3, 6, 12, 18], ch, 1024),
            'conv2': make_classifier(pg, [3, 6, 12, 18], ch, 512),
            'conv1': make_classifier(pg, [3, 6, 12, 18], ch, 256),
            'racb_43': make_rcab(pg, ch * 2),
            'racb_432': make_rcab(pg, ch * 3),
            'racb_4321': make_rcab(pg, ch * 4),
            'conv43': make_classifier(pg, [3, 6, 12, 18], ch, 2 * ch),
            'conv432': make_classifier(pg, [3, 6, 12, 18], ch, 3 * ch),
            'cls': make_classifier(pg, [6, 12, 18, 24], 1, ch * 4)}


def gkern_1d(kernlen=31, nsig=4):
    # gkern(31,4) = sqrt(outer(k1d,k1d)) / sum = outer(g, g) with g = sqrt(k1d)/sum(sqrt(k1d))
    # -> the 31x31 Gaussian is exactly rank-1 / separable.
    interval = (2 * nsig + 1.0) / kernlen
    xs = np.linspace(-nsig - interval / 2.0, nsig + interval / 2.0, kernlen + 1)
    cdf = np.array([0.5 * (1.0 + math.erf(v / math.sqrt(2.0))) for v in xs])
    kern1d = np.diff(cdf)
    v = np.sqrt(kern1d)
    return (v / v.sum()).astype(np.float32)


def build_params(channel=8, seed=0):
    pg = ParamGen(seed)
    P = {}
    # B2_ResNet backbone (ResNet-50 with duplicated layer3/layer4 branches).
    P['conv1'] = _pack_conv(*pg.conv_np(7, 7, 3, 64))
    inplanes = 64
    P['layer1'], inplanes = make_layer(pg, inplanes, 64, 3, 1)
    P['layer2'], inplanes = make_layer(pg, inplanes, 128, 4, 2)
    P['layer3_1'], inplanes = make_layer(pg, inplanes, 256, 6, 2)
    P['layer4_1'], inplanes = make_layer(pg, inplanes, 512, 3, 2)
    inplanes = 512
    P['layer3_2'], inplanes = make_layer(pg, inplanes, 256, 6, 2)
    P['layer4_2'], inplanes = make_layer(pg, inplanes, 512, 3, 2)
    P['cod_dec'] = make_fix_dec(pg, channel)
    P['sal_dec'] = make_sal_dec(pg, channel)
    g1 = gkern_1d(31, 4)
    P['ha_gv'] = _pack_conv(g1.reshape(31, 1, 1, 1), np.zeros((1,), np.float32))
    P['ha_gh'] = _pack_conv(g1.reshape(1, 31, 1, 1), np.zeros((1,), np.float32))
    return P


# ----------------------------- forward pieces -----------------------------


def bottleneck_fwd(p, x):
    # BatchNorm (inference mode, identity statistics) is folded away; ReLU and the
    # residual add are fused into the Pallas GEMM epilogues.
    out = apply_conv(x, p['c1'], relu=True)
    out = apply_conv(out, p['c2'], stride=p['stride'], padding=1, relu=True)
    if 'ds' in p:
        identity = apply_conv(x, p['ds'], stride=p['stride'])
    else:
        identity = x
    return apply_conv(out, p['c3'], residual=identity, relu=True)


def run_layer(layer, x):
    for p in layer:
        x = bottleneck_fwd(p, x)
    return x


def ca_fwd(p, x, residual):
    Nb, H, W, C = x.shape
    out = _ca_apply(x.astype(jnp.bfloat16).reshape(Nb, H * W, C),
                    residual.astype(jnp.bfloat16).reshape(Nb, H * W, C),
                    p['w1'], p['b1'], p['w2'], p['b2'])
    return out.reshape(Nb, H, W, C)


def rcab_fwd(p, x):
    res = apply_conv(x, p['conv1'], padding=1, relu=True)
    res = apply_conv(res, p['conv2'], padding=1)
    return ca_fwd(p['ca'], res, x)          # CA + residual add fused


def fix_dec_fwd(p, x1, x2, x3, x4):
    c1 = apply_classifier(x1, p['conv1'])
    c2 = apply_classifier(x2, p['conv2'])
    c3 = apply_classifier(x3, p['conv3'])
    c4 = apply_classifier(x4, p['conv4'])
    cat = jnp.concatenate([c1, _up(c2, 2), _up(c3, 4), _up(c4, 8)], axis=-1)
    cat = rcab_fwd(p['racb4'], cat)
    return apply_classifier(cat, p['cls'])


def sal_dec_fwd(p, x1, x2, x3, x4):
    c1 = apply_classifier(x1, p['conv1'])
    c2 = apply_classifier(x2, p['conv2'])
    c3 = apply_classifier(x3, p['conv3'])
    c4 = apply_classifier(x4, p['conv4'])
    c4 = _up(c4, 2)
    c43 = jnp.concatenate([c4, c3], axis=-1)
    c43 = rcab_fwd(p['racb_43'], c43)
    c43 = apply_classifier(c43, p['conv43'])
    c43 = _up(c43, 2)
    c432 = jnp.concatenate([_up(c4, 2), c43, c2], axis=-1)
    c432 = rcab_fwd(p['racb_432'], c432)
    c432 = apply_classifier(c432, p['conv432'])
    c432 = _up(c432, 2)
    c4321 = jnp.concatenate([_up(c4, 4), _up(c43, 2), c432, c1], axis=-1)
    c4321 = rcab_fwd(p['racb_4321'], c4321)
    return apply_classifier(c4321, p['cls'])


def ha_fwd(gv_pk, gh_pk, attention, x):
    # Separable 31x31 Gaussian blur: vertical 1-D conv then horizontal 1-D conv.
    soft = apply_conv(attention, gv_pk, padding=(15, 0))
    soft = apply_conv(soft, gh_pk, padding=(0, 15))
    Nb, H, W, C = x.shape
    out = _ha_apply(soft.reshape(Nb, H * W, 1), attention.reshape(Nb, H * W, 1),
                    x.astype(jnp.bfloat16).reshape(Nb, H * W, C))
    return out.reshape(Nb, H, W, C)


def saliency_feat_encoder_fwd(P, x):
    # stem: conv1 + bn1(identity) + relu + maxpool
    x = apply_conv(x, P['conv1'], stride=2, padding=3, relu=True)
    x = maxpool_3x3_s2_p1(x)
    x1 = run_layer(P['layer1'], x)
    x2 = run_layer(P['layer2'], x1)
    x3 = run_layer(P['layer3_1'], x2)
    x4 = run_layer(P['layer4_1'], x3)

    fix_pred = fix_dec_fwd(P['cod_dec'], x1, x2, x3, x4)
    init_pred = sal_dec_fwd(P['sal_dec'], x1, x2, x3, x4)

    att = upsample_bilinear(fix_pred, out_h=fix_pred.shape[1] // 2,
                            out_w=fix_pred.shape[2] // 2)       # upsample05
    att = _one_minus_sigmoid(att)                               # 1 - sigmoid(.)
    x2_2 = ha_fwd(P['ha_gv'], P['ha_gh'], att, x2)
    x3_2 = run_layer(P['layer3_2'], x2_2)
    x4_2 = run_layer(P['layer4_2'], x3_2)
    ref_pred = sal_dec_fwd(P['sal_dec'], x1, x2_2, x3_2, x4_2)

    return (_up(fix_pred, 4).astype(jnp.float32),
            _up(init_pred, 4).astype(jnp.float32),
            _up(ref_pred, 4).astype(jnp.float32))


# ----------------------------- main -----------------------------

if __name__ == "__main__":
    channel = 8
    params = build_params(channel=channel, seed=0)
    x = jax.random.normal(jax.random.PRNGKey(0), (2, 64, 64, 3), jnp.float32)  # NHWC input
    fix_up, init_up, ref_up = saliency_feat_encoder_fwd(params, x)
    jax.block_until_ready((fix_up, init_up, ref_up))
    assert fix_up.shape == (2, 64, 64, 1)
    assert init_up.shape == (2, 64, 64, 1)
    assert ref_up.shape == (2, 64, 64, 1)
    assert bool(jnp.all(jnp.isfinite(fix_up)))
    assert bool(jnp.all(jnp.isfinite(init_up)))
    assert bool(jnp.all(jnp.isfinite(ref_up)))
    print("KERNEL_OK")
</pallas_src>

<mosaic_0001>
module attributes {stable_mosaic.version = 11 : i64} {
  func.func @_mm_simple_kernel(%arg0: i32, %arg1: i32, %arg2: memref<512x256xbf16, #tpu.memory_space<vmem>>, %arg3: memref<256x128xbf16, #tpu.memory_space<vmem>>, %arg4: memref<1x128xf32, #tpu.memory_space<vmem>>, %arg5: memref<512x128xbf16, #tpu.memory_space<vmem>>) attributes {dimension_semantics = [#tpu.dimension_semantics<parallel>, #tpu.dimension_semantics<parallel>], iteration_bounds = array<i64: 4, 1>, scalar_prefetch = 0 : i64, scratch_operands = 0 : i64, tpu.core_type = #tpu.core_type<tc>, window_params = [{transform_indices = @transform_0, window_bounds = array<i64: 512, 256>}, {transform_indices = @transform_1, window_bounds = array<i64: 256, 128>}, {transform_indices = @transform_2, window_bounds = array<i64: 1, 128>}, {transform_indices = @transform_3, window_bounds = array<i64: 512, 128>}]} {
    %c0 = arith.constant 0 : index
    %c0_0 = arith.constant 0 : index
    %0 = vector.load %arg2[%c0, %c0_0] : memref<512x256xbf16, #tpu.memory_space<vmem>>, vector<512x256xbf16>
    %c0_1 = arith.constant 0 : index
    %c0_2 = arith.constant 0 : index
    %1 = vector.load %arg3[%c0_1, %c0_2] : memref<256x128xbf16, #tpu.memory_space<vmem>>, vector<256x128xbf16>
    %cst = arith.constant dense<0.000000e+00> : vector<512x128xf32>
    %2 = tpu.matmul %0, %1, %cst {dimension_numbers = #tpu.dot_dimension_numbers<[1], [0], [0], [1], [0, 0, 1, 1], [], []>} : vector<512x256xbf16>, vector<256x128xbf16>, vector<512x128xf32> -> vector<512x128xf32>
    %c0_3 = arith.constant 0 : index
    %c0_4 = arith.constant 0 : index
    %3 = vector.load %arg4[%c0_3, %c0_4] : memref<1x128xf32, #tpu.memory_space<vmem>>, vector<1x128xf32>
    %4 = vector.broadcast %3 : vector<1x128xf32> to vector<512x128xf32>
    %5 = arith.addf %2, %4 : vector<512x128xf32>
    %cst_5 = arith.constant 0.000000e+00 : f32
    %6 = vector.broadcast %cst_5 : f32 to vector<512x128xf32>
    %7 = arith.maximumf %5, %6 : vector<512x128xf32>
    %8 = arith.truncf %7 : vector<512x128xf32> to vector<512x128xbf16>
    %c0_6 = arith.constant 0 : index
    %c0_7 = arith.constant 0 : index
    %9 = vector.load %arg5[%c0_6, %c0_7] : memref<512x128xbf16, #tpu.memory_space<vmem>>, vector<512x128xbf16>
    tpu.vector_store %arg5[%c0_6, %c0_7], %8 {strides = array<i32>} : memref<512x128xbf16, #tpu.memory_space<vmem>>, vector<512x128xbf16>,
    return
  }
  func.func @transform_0(%arg0: i32, %arg1: i32) -> (i32, i32) {
    %c0_i32 = arith.constant 0 : i32
    %c0_i32_0 = arith.constant 0 : i32
    return %arg0, %c0_i32 : i32, i32
  }
  func.func @transform_1(%arg0: i32, %arg1: i32) -> (i32, i32) {
    %c0_i32 = arith.constant 0 : i32
    %c0_i32_0 = arith.constant 0 : i32
    return %c0_i32, %arg1 : i32, i32
  }
  func.func @transform_2(%arg0: i32, %arg1: i32) -> (i32, i32) {
    %c0_i32 = arith.constant 0 : i32
    %c0_i32_0 = arith.constant 0 : i32
    return %c0_i32, %arg1 : i32, i32
  }
  func.func @transform_3(%arg0: i32, %arg1: i32) -> (i32, i32) {
    %c0_i32 = arith.constant 0 : i32
    return %arg0, %arg1 : i32, i32
  }
}

</mosaic_0001>

<bundles_post_ra>
// kernel: _conv2d_jit.1
= control target key start
LH: loop header
LB: loop body
LE: loop exit
PB: predicated region body
PF: predicated region fallthrough
CT: control target
= control target key end

     0   :  { %8 = vsyncpa [#allocation3], 0  ;;  %s2619_s0 = inlined_call_operand.vmem [shape: bf16[2048,256], index: 0, kind: input, shape index: {}]   ;;  %s2620_s1 = inlined_call_operand.vmem [shape: bf16[256,128], index: 1, kind: input, shape index: {}]   ;;  %s2621_s2 = inlined_call_operand.vmem [shape: f32[1,128], index: 2, kind: input, shape index: {}]   ;;  %s2622_s3 = inlined_call_operand.hbm [shape: bf16[2048,128], index: 3, kind: output, shape index: {}]  }
   0x1   :  { %10 = vsyncpa [#allocation3 + $0x1], 0  ;;  %s2251_s12 = smov 0   ;;  %s2253_s13 = smov 0  }
   0x2   :  { %s2255_s14 = smov 0   ;;  %s2257_s15 = smov 0  }
   0x3   :  { %s2259_s16 = smov 0   ;;  %s2261_s17 = smov 0  }
   0x4 LB: > { %s1527_s18 = sadd.s32 4294967295, %s2225_s17   ;;  %s1528_s19 = sadd.s32 4294967294, %s2225_s17   ;;  %s2225_s17 = sphi %s2261_s17, %s16_s17   ;;  %s2221_s16 = sphi %s2259_s16, %s2629_s16   ;;  %s2217_s15 = sphi %s2257_s15, %s2628_s15   ;;  %s2213_s14 = sphi %s2255_s14, %s2627_s14   ;;  %s2209_s13 = sphi %s2253_s13, %s2626_s13   ;;  %s2205_s12 = sphi %s2251_s12, %s2625_s12  }
   0x5   : > { %s28_s20 = sadd.s32 1, %s2221_s16  ;;  %s115_s21 = sadd.s32 1, %s2213_s14 }
   0x6   : > { %p30_p0 = scmp.ge.s32.totalorder %s28_s20, 4  ;;  %p125_p1 = scmp.ne.s32.totalorder %s2213_s14, %s2209_s13 }
   0x7   : > { %p126_p2 = scmp.eq.s32.totalorder %s1527_s18, 3  ;;  %p131_p3 = scmp.ne.s32.totalorder %s2209_s13, %s2205_s12 }
   0x8   : > { %s2631_s20 = smov (%p30_p0, %s28_s20), 0  ;;  %p132_p5 = scmp.eq.s32.totalorder %s1528_s19, 3 }
   0x9   : > { %p2291_p4 = por %p126_p2, %p125_p1  ;;  %s110_s23 = ssub.s32 %s2221_s16, %s2631_s20 }
   0xa   : > { %p1533_p6 = scmp.ge.s32.totalorder %s2225_s17, 1  ;;  %p113_p7 = scmp.eq.s32.totalorder %s110_s23, 0 }
   0xb   : > { %p2298_p8 = por %p132_p5, %p131_p3  ;;  %p173_p9 = scmp.lt.s32.totalorder %s2225_s17, 5 }
   0xc   : > { %s2304_s25 = scalar_select %p113_p7, %s2213_s14, %s115_s21  }
   0xd   : > { %p174_p10 = pnand %p1533_p6, %p173_p9 }
   0xe   : > { %v2035_v0 = vld [vmem:[%s2620_s1] sm:$0xff] (!%p174_p10)   ;;  %v2227_v1 = vmov (!%p174_p10), 0   ;;  %s1535_s28 = sshll.u32 (!%p174_p10), %s2217_s15, 6  ;;  %v2036_v2 = vld [vmem:[%s2620_s1 + $0x8] sm:$0xff] (!%p174_p10)   ;;  %v2037_v3 = vld [vmem:[%s2620_s1 + $0x10] sm:$0xff] (!%p174_p10)   ;;  %s202_s5 = sand.u32 (!%p174_p10), 1, %s2209_s13  }
   0xf   : > { %177 = sbr.rel (%p174_p10) target bundleno = 434 (0x1b2), region = 32  ;;  %740 = vmatprep.subr.bf16.mxu0 (!%p174_p10), %v2227_v1  ;;  %1945 = vmatprep.subr.bf16.mxu1 (!%p174_p10), %v2227_v1  ;;  %p206_p11 = scmp.lt.s32.totalorder (!%p174_p10), %s1535_s28, 255  ;;  %v2038_v4 = vld [vmem:[%s2620_s1 + $0x18] sm:$0xff] (!%p174_p10)   ;;  %v2039_v5 = vld [vmem:[%s2620_s1 + $0x20] sm:$0xff] (!%p174_p10)   ;;  %v2040_v7 = vld [vmem:[%s2620_s1 + $0x28] sm:$0xff] (!%p174_p10)  }
  0x10   : > { %741 = vmatpush1.bf16.msra.mxu0 (!%p174_p10), %v2035_v0  ;;  %1961 = vmatpush1.bf16.msra.mxu1 (!%p174_p10), %v2035_v0  ;;  %v2041_v9 = vld [vmem:[%s2620_s1 + $0x30] sm:$0xff] (!%p174_p10)   ;;  %v2042_v10 = vld [vmem:[%s2620_s1 + $0x38] sm:$0xff] (!%p174_p10)   ;;  %v2043_v11 = vld [vmem:[%s2620_s1 + $0x40] sm:$0xff] (!%p174_p10)   ;;  %s1753_s7 = sshll.u32 (!%p174_p10), %s2217_s15, 12  ;;  %s2573_s15 = scalar_lea.sflag (!%p174_p10), [#allocation3], %s202_s5 }
  0x11   : > { %742 = vmatprep.subr.bf16.mxu0 (!%p174_p10), %v2227_v1  ;;  %1946 = vmatprep.subr.bf16.mxu1 (!%p174_p10), %v2227_v1  ;;  %v2044_v12 = vld [vmem:[%s2620_s1 + $0x48] sm:$0xff] (!%p174_p10)   ;;  %v2045_v13 = vld [vmem:[%s2620_s1 + $0x50] sm:$0xff] (!%p174_p10)   ;;  %v2046_v14 = vld [vmem:[%s2620_s1 + $0x58] sm:$0xff] (!%p174_p10)   ;;  %s2565_s11 = scalar_lea.hbm (!%p174_p10), %s2622_s3, %s1753_s7  ;;  %s2228_s21 = smov (!%p174_p10), [#allocation2]  }
  0x12   : > { %v2047_v15 = vld [vmem:[%s2620_s1 + $0x60] sm:$0xff] (!%p174_p10)   ;;  %v2048_v16 = vld [vmem:[%s2620_s1 + $0x68] sm:$0xff] (!%p174_p10)   ;;  %v2049_v17 = vld [vmem:[%s2620_s1 + $0x70] sm:$0xff] (!%p174_p10)   ;;  %s2151_s23 = sshll.u32 (!%p174_p10), %s2228_s21, 4  ;;  %s2152_s23 = int_to_ptr.vmem [resolvable:$false] %s2151_s23 }
  0x13   : > { %v2050_v18 = vld [vmem:[%s2620_s1 + $0x78] sm:$0xff] (!%p174_p10)   ;;  %s2153_s26 = scalar_lea.vmem (!%p174_p10), %s2152_s23, 8192 }
  0x14   : > { %743 = vmatpush1.bf16.msra.mxu0 (!%p174_p10), %v2036_v2  ;;  %1962 = vmatpush1.bf16.msra.mxu1 (!%p174_p10), %v2036_v2 }
  0x15   : > { %744 = vmatprep.subr.bf16.mxu0 (!%p174_p10), %v2227_v1  ;;  %1947 = vmatprep.subr.bf16.mxu1 (!%p174_p10), %v2227_v1 }
  0x16   : > { %s2633_s28 = smov (!%p206_p11, %s1535_s28), 255 }
  0x17   : > { %s1688_s8 = sshll.u32 %s2633_s28, 3 }
  0x18   : > { %745 = vmatpush1.bf16.msra.mxu0 %v2037_v3  ;;  %1963 = vmatpush1.bf16.msra.mxu1 %v2037_v3  ;;  %s2333_s19 = scalar_lea.vmem %s2619_s0, %s1688_s8 }
  0x19   : > { %746 = vmatprep.subr.bf16.mxu0 %v2227_v1  ;;  %1948 = vmatprep.subr.bf16.mxu1 %v2227_v1  ;;  %v2053_v6 = vld [vmem:[%s2333_s19 + $0x4] ss:$8 sps:$4 sm:$0xff]   ;;  %v2051_v19 = vld [vmem:[%s2333_s19] ss:$8 sps:$4 sm:$0xff]   ;;  %v2057_v21 = vld [vmem:[%s2333_s19 + $0x14] ss:$8 sps:$4 sm:$0xff]  }
  0x1a   : > { %v2056_v8 = vld [vmem:[%s2333_s19 + $0x104] ss:$8 sps:$4 sm:$0xff]   ;;  %772 = vmatprep.mubr.bf16.mxu0 %v2053_v6  ;;  %v2054_v20 = vld [vmem:[%s2333_s19 + $0x100] ss:$8 sps:$4 sm:$0xff]   ;;  %v2059_v22 = vld [vmem:[%s2333_s19 + $0x114] ss:$8 sps:$4 sm:$0xff]  }
  0x1b   : > { %900 = vmatprep.mubr.bf16.mxu1 %v2056_v8  ;;  %v2061_v23 = vld [vmem:[%s2333_s19 + $0x10] ss:$8 sps:$4 sm:$0xff]   ;;  %v2063_v25 = vld [vmem:[%s2333_s19 + $0x24] ss:$8 sps:$4 sm:$0xff]   ;;  %v2067_v27 = vld [vmem:[%s2333_s19 + $0x20] ss:$8 sps:$4 sm:$0xff]  }
  0x1c   : > { %747 = vmatpush1.bf16.msra.mxu0 %v2038_v4  ;;  %1964 = vmatpush1.bf16.msra.mxu1 %v2038_v4  ;;  %v2062_v24 = vld [vmem:[%s2333_s19 + $0x110] ss:$8 sps:$4 sm:$0xff]   ;;  %v2065_v26 = vld [vmem:[%s2333_s19 + $0x124] ss:$8 sps:$4 sm:$0xff]   ;;  %v2068_v28 = vld [vmem:[%s2333_s19 + $0x120] ss:$8 sps:$4 sm:$0xff]  }
  0x1d   : > { %748 = vmatprep.subr.bf16.mxu0 %v2227_v1  ;;  %1949 = vmatprep.subr.bf16.mxu1 %v2227_v1  ;;  %v2069_v29 = vld [vmem:[%s2333_s19 + $0x34] ss:$8 sps:$4 sm:$0xff]   ;;  %v2073_v31 = vld [vmem:[%s2333_s19 + $0x30] ss:$8 sps:$4 sm:$0xff]   ;;  %v2075_v33 = vld [vmem:[%s2333_s19 + $0x44] ss:$8 sps:$4 sm:$0xff]  }
  0x1e   : > { %v2071_v30 = vld [vmem:[%s2333_s19 + $0x134] ss:$8 sps:$4 sm:$0xff]   ;;  %v2074_v32 = vld [vmem:[%s2333_s19 + $0x130] ss:$8 sps:$4 sm:$0xff]   ;;  %v2077_v34 = vld [vmem:[%s2333_s19 + $0x144] ss:$8 sps:$4 sm:$0xff]  }
  0x1f   : > { %v2079_v35 = vld [vmem:[%s2333_s19 + $0x40] ss:$8 sps:$4 sm:$0xff]   ;;  %v2081_v37 = vld [vmem:[%s2333_s19 + $0x54] ss:$8 sps:$4 sm:$0xff]   ;;  %v2085_v39 = vld [vmem:[%s2333_s19 + $0x50] ss:$8 sps:$4 sm:$0xff]  }
  0x20   : > { %749 = vmatpush1.bf16.msra.mxu0 %v2039_v5  ;;  %1965 = vmatpush1.bf16.msra.mxu1 %v2039_v5  ;;  %v2080_v36 = vld [vmem:[%s2333_s19 + $0x140] ss:$8 sps:$4 sm:$0xff]   ;;  %v2083_v38 = vld [vmem:[%s2333_s19 + $0x154] ss:$8 sps:$4 sm:$0xff]   ;;  %v2086_v40 = vld [vmem:[%s2333_s19 + $0x150] ss:$8 sps:$4 sm:$0xff]  }
  0x21   : > { %750 = vmatprep.subr.bf16.mxu0 %v2227_v1  ;;  %1950 = vmatprep.subr.bf16.mxu1 %v2227_v1  ;;  %v2087_v41 = vld [vmem:[%s2333_s19 + $0x64] ss:$8 sps:$4 sm:$0xff]   ;;  %v2091_v43 = vld [vmem:[%s2333_s19 + $0x60] ss:$8 sps:$4 sm:$0xff]   ;;  %v2093_v45 = vld [vmem:[%s2333_s19 + $0x74] ss:$8 sps:$4 sm:$0xff]  }
  0x22   : > { %v2089_v42 = vld [vmem:[%s2333_s19 + $0x164] ss:$8 sps:$4 sm:$0xff]   ;;  %v2092_v44 = vld [vmem:[%s2333_s19 + $0x160] ss:$8 sps:$4 sm:$0xff]   ;;  %v2095_v46 = vld [vmem:[%s2333_s19 + $0x174] ss:$8 sps:$4 sm:$0xff]  }
  0x23   : > { %v2097_v47 = vld [vmem:[%s2333_s19 + $0x70] ss:$8 sps:$4 sm:$0xff]   ;;  %v2099_v49 = vld [vmem:[%s2333_s19 + $0x84] ss:$8 sps:$4 sm:$0xff]   ;;  %v2103_v51 = vld [vmem:[%s2333_s19 + $0x80] ss:$8 sps:$4 sm:$0xff]  }
  0x24   : > { %751 = vmatpush1.bf16.msra.mxu0 %v2040_v7  ;;  %1966 = vmatpush1.bf16.msra.mxu1 %v2040_v7  ;;  %v2098_v48 = vld [vmem:[%s2333_s19 + $0x170] ss:$8 sps:$4 sm:$0xff]   ;;  %v2101_v50 = vld [vmem:[%s2333_s19 + $0x184] ss:$8 sps:$4 sm:$0xff]   ;;  %v2104_v52 = vld [vmem:[%s2333_s19 + $0x180] ss:$8 sps:$4 sm:$0xff]  }
  0x25   : > { %752 = vmatprep.subr.bf16.mxu0 %v2227_v1  ;;  %1951 = vmatprep.subr.bf16.mxu1 %v2227_v1  ;;  %v2105_v53 = vld [vmem:[%s2333_s19 + $0x94] ss:$8 sps:$4 sm:$0xff]   ;;  %v2109_v55 = vld [vmem:[%s2333_s19 + $0x90] ss:$8 sps:$4 sm:$0xff]   ;;  %v2111_v57 = vld [vmem:[%s2333_s19 + $0xa4] ss:$8 sps:$4 sm:$0xff]  }
  0x26   : > { %v2107_v54 = vld [vmem:[%s2333_s19 + $0x194] ss:$8 sps:$4 sm:$0xff]   ;;  %v2110_v56 = vld [vmem:[%s2333_s19 + $0x190] ss:$8 sps:$4 sm:$0xff]   ;;  %v2113_v58 = vld [vmem:[%s2333_s19 + $0x1a4] ss:$8 sps:$4 sm:$0xff]  }
  0x27   : > { %v2115_v59 = vld [vmem:[%s2333_s19 + $0xa0] ss:$8 sps:$4 sm:$0xff]   ;;  %v2117_v61 = vld [vmem:[%s2333_s19 + $0xb4] ss:$8 sps:$4 sm:$0xff]   ;;  %v2121_v63 = vld [vmem:[%s2333_s19 + $0xb0] ss:$8 sps:$4 sm:$0xff]  }
  0x28   : > { %753 = vmatpush1.bf16.msra.mxu0 %v2041_v9  ;;  %1967 = vmatpush1.bf16.msra.mxu1 %v2041_v9  ;;  %v2116_v60 = vld [vmem:[%s2333_s19 + $0x1a0] ss:$8 sps:$4 sm:$0xff]   ;;  %v2119_v62 = vld [vmem:[%s2333_s19 + $0x1b4] ss:$8 sps:$4 sm:$0xff]   ;;  %v2122_v0 = vld [vmem:[%s2333_s19 + $0x1b0] ss:$8 sps:$4 sm:$0xff]  }
  0x29   : > { %754 = vmatprep.subr.bf16.mxu0 %v2227_v1  ;;  %1952 = vmatprep.subr.bf16.mxu1 %v2227_v1  ;;  %v2125_v2 = vld [vmem:[%s2333_s19 + $0x1c4] ss:$8 sps:$4 sm:$0xff]   ;;  %v2127_v3 = vld [vmem:[%s2333_s19 + $0xc0] ss:$8 sps:$4 sm:$0xff]   ;;  %v2129_v5 = vld [vmem:[%s2333_s19 + $0xd4] ss:$8 sps:$4 sm:$0xff]  }
  0x2a   : > { %v2128_v4 = vld [vmem:[%s2333_s19 + $0x1c0] ss:$8 sps:$4 sm:$0xff]   ;;  %v2131_v6 = vld [vmem:[%s2333_s19 + $0x1d4] ss:$8 sps:$4 sm:$0xff]   ;;  %v2133_v7 = vld [vmem:[%s2333_s19 + $0xd0] ss:$8 sps:$4 sm:$0xff]  }
  0x2b   : > { %v2134_v8 = vld [vmem:[%s2333_s19 + $0x1d0] ss:$8 sps:$4 sm:$0xff]   ;;  %v2135_v9 = vld [vmem:[%s2333_s19 + $0xe4] ss:$8 sps:$4 sm:$0xff]  }
  0x2c   : > { %755 = vmatpush1.bf16.msra.mxu0 %v2042_v10  ;;  %1968 = vmatpush1.bf16.msra.mxu1 %v2042_v10  ;;  %v2137_v10 = vld [vmem:[%s2333_s19 + $0x1e4] ss:$8 sps:$4 sm:$0xff]  }
  0x2d   : > { %756 = vmatprep.subr.bf16.mxu0 %v2227_v1  ;;  %1953 = vmatprep.subr.bf16.mxu1 %v2227_v1 }
  0x30   : > { %757 = vmatpush1.bf16.msra.mxu0 %v2043_v11  ;;  %1969 = vmatpush1.bf16.msra.mxu1 %v2043_v11  ;;  %v2139_v11 = vld [vmem:[%s2333_s19 + $0xe0] ss:$8 sps:$4 sm:$0xff]  }
  0x31   : > { %758 = vmatprep.subr.bf16.mxu0 %v2227_v1  ;;  %1954 = vmatprep.subr.bf16.mxu1 %v2227_v1 }
  0x34   : > { %759 = vmatpush1.bf16.msra.mxu0 %v2044_v12  ;;  %1970 = vmatpush1.bf16.msra.mxu1 %v2044_v12  ;;  %v2140_v12 = vld [vmem:[%s2333_s19 + $0x1e0] ss:$8 sps:$4 sm:$0xff]  }
  0x35   : > { %760 = vmatprep.subr.bf16.mxu0 %v2227_v1  ;;  %1955 = vmatprep.subr.bf16.mxu1 %v2227_v1 }
  0x38   : > { %761 = vmatpush1.bf16.msra.mxu0 %v2045_v13  ;;  %1971 = vmatpush1.bf16.msra.mxu1 %v2045_v13  ;;  %v2141_v13 = vld [vmem:[%s2333_s19 + $0xf4] ss:$8 sps:$4 sm:$0xff]  }
  0x39   : > { %762 = vmatprep.subr.bf16.mxu0 %v2227_v1  ;;  %1956 = vmatprep.subr.bf16.mxu1 %v2227_v1 }
  0x3c   : > { %763 = vmatpush1.bf16.msra.mxu0 %v2046_v14  ;;  %1972 = vmatpush1.bf16.msra.mxu1 %v2046_v14  ;;  %v2143_v14 = vld [vmem:[%s2333_s19 + $0x1f4] ss:$8 sps:$4 sm:$0xff]  }
  0x3d   : > { %764 = vmatprep.subr.bf16.mxu0 %v2227_v1  ;;  %1957 = vmatprep.subr.bf16.mxu1 %v2227_v1 }
  0x40   : > { %765 = vmatpush1.bf16.msra.mxu0 %v2047_v15  ;;  %1973 = vmatpush1.bf16.msra.mxu1 %v2047_v15  ;;  %v2145_v15 = vld [vmem:[%s2333_s19 + $0xf0] ss:$8 sps:$4 sm:$0xff]  }
  0x41   : > { %766 = vmatprep.subr.bf16.mxu0 %v2227_v1  ;;  %1958 = vmatprep.subr.bf16.mxu1 %v2227_v1 }
  0x44   : > { %767 = vmatpush1.bf16.msra.mxu0 %v2048_v16  ;;  %1974 = vmatpush1.bf16.msra.mxu1 %v2048_v16  ;;  %v2146_v16 = vld [vmem:[%s2333_s19 + $0x1f0] ss:$8 sps:$4 sm:$0xff]  }
  0x45   : > { %768 = vmatprep.subr.bf16.mxu0 %v2227_v1  ;;  %1959 = vmatprep.subr.bf16.mxu1 %v2227_v1 }
  0x48   : > { %769 = vmatpush1.bf16.msra.mxu0 %v2049_v17  ;;  %1975 = vmatpush1.bf16.msra.mxu1 %v2049_v17  ;;  %v2459_v17 = vld [vmem:[%s2621_s2] ss:$0 sm:$0xff] }
  0x49   : > { %770 = vmatprep.subr.bf16.mxu0 %v2227_v1  ;;  %1960 = vmatprep.subr.bf16.mxu1 %v2227_v1  ;;  %v2123_v1 = vld [vmem:[%s2333_s19 + $0xc4] ss:$8 sps:$4 sm:$0xff]   ;;  %s1534_s19 = sshll.u32 %s202_s5, 8 }
  0x4a   : > { %s2468_s6 = scalar_lea.vmem [#allocation2], %s1534_s19 }
  0x4b   : > { %s1428_s8 = sshll.u32 %s2468_s6, 4  ;;  %s2567_s8 = int_to_ptr.vmem [resolvable:$true] %s1428_s8 }
  0x4c   : > { %771 = vmatpush1.bf16.msra.mxu0 %v2050_v18  ;;  %1976 = vmatpush1.bf16.msra.mxu1 %v2050_v18  ;;  %s2147_s18 = scalar_lea.vmem %s2567_s8, 4096  ;;  %p2154_p1 = scmp.lt.s32.totalorder %s2567_s8, %s2152_s23 }
  0x4d   : > { %p2148_p12 = scmp.ne.s32.totalorder %s2567_s8, %s2147_s18  ;;  %p2155_p2 = scmp.lt.s32.totalorder %s2153_s26, %s2147_s18 }
  0x4f   : > { %773 = vmatmul.mubr.bf16.vlgmr.msra.gmra.mrb[0].mxu0 %v2051_v19  ;;  %901 = vmatmul.mubr.bf16.vlgmr.msra.gmra.mrb[0].mxu1 %v2054_v20  ;;  %p2149_p13 = pnand %p2148_p12, %p2291_p4  ;;  %p2156_p3 = por %p2155_p2, %p2154_p1 }
  0x50   : > { %780 = vmatprep.mubr.bf16.mxu0 %v2057_v21  ;;  %908 = vmatprep.mubr.bf16.mxu1 %v2059_v22 }
  0x51   : > { %p2150_p0 = pneg %p2149_p13 }
  0x53   : > { %p2157_p5 = pnand %p2156_p3, %p2150_p0 }
  0x57   : > { %781 = vmatmul.mubr.bf16.gmra.mrb[4].mxu0 %v2061_v23  ;;  %909 = vmatmul.mubr.bf16.gmra.mrb[4].mxu1 %v2062_v24 }
  0x58   : > { %788 = vmatprep.mubr.bf16.mxu0 %v2063_v25  ;;  %916 = vmatprep.mubr.bf16.mxu1 %v2065_v26 }
  0x5f   : > { %789 = vmatmul.mubr.bf16.gmra.mrb[8].mxu0 %v2067_v27  ;;  %917 = vmatmul.mubr.bf16.gmra.mrb[8].mxu1 %v2068_v28 }
  0x60   : > { %796 = vmatprep.mubr.bf16.mxu0 %v2069_v29  ;;  %924 = vmatprep.mubr.bf16.mxu1 %v2071_v30 }
  0x67   : > { %797 = vmatmul.mubr.bf16.gmra.mrb[12].mxu0 %v2073_v31  ;;  %925 = vmatmul.mubr.bf16.gmra.mrb[12].mxu1 %v2074_v32 }
  0x68   : > { %804 = vmatprep.mubr.bf16.mxu0 %v2075_v33  ;;  %932 = vmatprep.mubr.bf16.mxu1 %v2077_v34 }
  0x6f   : > { %805 = vmatmul.mubr.bf16.gmra.mrb[16].mxu0 %v2079_v35  ;;  %933 = vmatmul.mubr.bf16.gmra.mrb[16].mxu1 %v2080_v36 }
  0x70   : > { %812 = vmatprep.mubr.bf16.mxu0 %v2081_v37  ;;  %940 = vmatprep.mubr.bf16.mxu1 %v2083_v38 }
  0x77   : > { %813 = vmatmul.mubr.bf16.gmra.mrb[20].mxu0 %v2085_v39  ;;  %941 = vmatmul.mubr.bf16.gmra.mrb[20].mxu1 %v2086_v40 }
  0x78   : > { %820 = vmatprep.mubr.bf16.mxu0 %v2087_v41  ;;  %948 = vmatprep.mubr.bf16.mxu1 %v2089_v42 }
  0x7f   : > { %821 = vmatmul.mubr.bf16.gmra.mrb[24].mxu0 %v2091_v43  ;;  %949 = vmatmul.mubr.bf16.gmra.mrb[24].mxu1 %v2092_v44 }
  0x80   : > { %828 = vmatprep.mubr.bf16.mxu0 %v2093_v45  ;;  %956 = vmatprep.mubr.bf16.mxu1 %v2095_v46 }
  0x87   : > { %829 = vmatmul.mubr.bf16.gmra.mrb[28].mxu0 %v2097_v47  ;;  %957 = vmatmul.mubr.bf16.gmra.mrb[28].mxu1 %v2098_v48 }
  0x88   : > { %836 = vmatprep.mubr.bf16.mxu0 %v2099_v49  ;;  %964 = vmatprep.mubr.bf16.mxu1 %v2101_v50 }
  0x8f   : > { %837 = vmatmul.mubr.bf16.gmra.mrb[32].mxu0 %v2103_v51  ;;  %965 = vmatmul.mubr.bf16.gmra.mrb[32].mxu1 %v2104_v52 }
  0x90   : > { %844 = vmatprep.mubr.bf16.mxu0 %v2105_v53  ;;  %972 = vmatprep.mubr.bf16.mxu1 %v2107_v54 }
  0x97   : > { %845 = vmatmul.mubr.bf16.gmra.mrb[36].mxu0 %v2109_v55  ;;  %973 = vmatmul.mubr.bf16.gmra.mrb[36].mxu1 %v2110_v56 }
  0x98   : > { %852 = vmatprep.mubr.bf16.mxu0 %v2111_v57  ;;  %980 = vmatprep.mubr.bf16.mxu1 %v2113_v58 }
  0x9f   : > { %853 = vmatmul.mubr.bf16.gmra.mrb[40].mxu0 %v2115_v59  ;;  %981 = vmatmul.mubr.bf16.gmra.mrb[40].mxu1 %v2116_v60 }
  0xa0   : > { %860 = vmatprep.mubr.bf16.mxu0 %v2117_v61  ;;  %988 = vmatprep.mubr.bf16.mxu1 %v2119_v62 }
  0xa7   : > { %861 = vmatmul.mubr.bf16.gmra.mrb[44].mxu0 %v2121_v63  ;;  %989 = vmatmul.mubr.bf16.gmra.mrb[44].mxu1 %v2122_v0 }
  0xa8   : > { %868 = vmatprep.mubr.bf16.mxu0 %v2123_v1  ;;  %996 = vmatprep.mubr.bf16.mxu1 %v2125_v2 }
  0xaf   : > { %869 = vmatmul.mubr.bf16.gmra.mrb[48].mxu0 %v2127_v3  ;;  %997 = vmatmul.mubr.bf16.gmra.mrb[48].mxu1 %v2128_v4 }
  0xb0   : > { %876 = vmatprep.mubr.bf16.mxu0 %v2129_v5  ;;  %1004 = vmatprep.mubr.bf16.mxu1 %v2131_v6 }
  0xb7   : > { %877 = vmatmul.mubr.bf16.gmra.mrb[52].mxu0 %v2133_v7  ;;  %1005 = vmatmul.mubr.bf16.gmra.mrb[52].mxu1 %v2134_v8 }
  0xb8   : > { %884 = vmatprep.mubr.bf16.mxu0 %v2135_v9  ;;  %1012 = vmatprep.mubr.bf16.mxu1 %v2137_v10 }
  0xbf   : > { %885 = vmatmul.mubr.bf16.gmra.mrb[56].mxu0 %v2139_v11  ;;  %1013 = vmatmul.mubr.bf16.gmra.mrb[56].mxu1 %v2140_v12 }
  0xc0   : > { %892 = vmatprep.mubr.bf16.mxu0 %v2141_v13  ;;  %1020 = vmatprep.mubr.bf16.mxu1 %v2143_v14 }
  0xc7   : > { %893 = vmatmul.mubr.bf16.gmra.mrb[60].mxu0 %v2145_v15  ;;  %1021 = vmatmul.mubr.bf16.gmra.mrb[60].mxu1 %v2146_v16 }
 0x122   : > { %v774_v18 = vpop.f32.mrb[0].mxu0  ;;  %v902_v19 = vpop.f32.mrb[0].mxu1 }
 0x123   : > { %v775_v20 = vadd.f32 %v2459_v17, %v774_v18  ;;  %v903_v21 = vadd.f32 %v2459_v17, %v902_v19  ;;  %v776_v22 = vpop.f32.mrb[1].mxu0  ;;  %v904_v23 = vpop.f32.mrb[1].mxu1 }
 0x124   : > { %v777_v24 = vpop.f32.mrb[2].mxu0  ;;  %v905_v25 = vpop.f32.mrb[2].mxu1 }
 0x125   : > { %v778_v26 = vadd.f32 %v2459_v17, %v777_v24  ;;  %v906_v27 = vadd.f32 %v2459_v17, %v905_v25  ;;  %v779_v28 = vpop.f32.mrb[3].mxu0  ;;  %v907_v29 = vpop.f32.mrb[3].mxu1  ;;  %v1029_v30 = vmax.f32 %v775_v20, 0.0  ;;  %v1061_v31 = vmax.f32 %v903_v21, 0.0 }
 0x127   : > { %v1030_v32 = vmax.f32 %v778_v26, 0.0  ;;  %v1062_v33 = vmax.f32 %v906_v27, 0.0 }
 0x129   : > { %v1757_v34 = vpack.c.bf16 %v1030_v32, %v1029_v30  ;;  %v1837_v35 = vpack.c.bf16 %v1062_v33, %v1061_v31 }
 0x12a   : > { %v782_v36 = vpop.f32.mrb[4].mxu0  ;;  %v910_v37 = vpop.f32.mrb[4].mxu1 }
 0x12b   : > { %1758 = vst [vmem:[%s2468_s6] sm:$0xff] %v1757_v34   ;;  %1929 = vst [vmem:[%s2468_s6 + $0x80] sm:$0xff] %v1837_v35   ;;  %v783_v38 = vadd.f32 %v2459_v17, %v782_v36  ;;  %v911_v39 = vadd.f32 %v2459_v17, %v910_v37  ;;  %v784_v40 = vpop.f32.mrb[5].mxu0  ;;  %v912_v41 = vpop.f32.mrb[5].mxu1 }
 0x12c   : > { %v785_v42 = vpop.f32.mrb[6].mxu0  ;;  %v913_v43 = vpop.f32.mrb[6].mxu1 }
 0x12d   : > { %v786_v44 = vadd.f32 %v2459_v17, %v785_v42  ;;  %v914_v45 = vadd.f32 %v2459_v17, %v913_v43  ;;  %v787_v46 = vpop.f32.mrb[7].mxu0  ;;  %v915_v47 = vpop.f32.mrb[7].mxu1  ;;  %v1031_v48 = vmax.f32 %v783_v38, 0.0  ;;  %v1063_v49 = vmax.f32 %v911_v39, 0.0 }
 0x12f   : > { %v1032_v50 = vmax.f32 %v786_v44, 0.0  ;;  %v1064_v51 = vmax.f32 %v914_v45, 0.0 }
 0x131   : > { %v1762_v52 = vpack.c.bf16 %v1032_v50, %v1031_v48  ;;  %v1842_v53 = vpack.c.bf16 %v1064_v51, %v1063_v49 }
 0x132   : > { %v790_v54 = vpop.f32.mrb[8].mxu0  ;;  %v918_v55 = vpop.f32.mrb[8].mxu1 }
 0x133   : > { %1914 = vst [vmem:[%s2468_s6 + $0x8] sm:$0xff] %v1762_v52   ;;  %1930 = vst [vmem:[%s2468_s6 + $0x88] sm:$0xff] %v1842_v53   ;;  %v791_v56 = vadd.f32 %v2459_v17, %v790_v54  ;;  %v919_v57 = vadd.f32 %v2459_v17, %v918_v55  ;;  %v792_v58 = vpop.f32.mrb[9].mxu0  ;;  %v920_v59 = vpop.f32.mrb[9].mxu1 }
 0x134   : > { %v793_v60 = vpop.f32.mrb[10].mxu0  ;;  %v921_v61 = vpop.f32.mrb[10].mxu1 }
 0x135   : > { %v794_v62 = vadd.f32 %v2459_v17, %v793_v60  ;;  %v922_v63 = vadd.f32 %v2459_v17, %v921_v61  ;;  %v795_v0 = vpop.f32.mrb[11].mxu0  ;;  %v923_v1 = vpop.f32.mrb[11].mxu1  ;;  %v1033_v2 = vmax.f32 %v791_v56, 0.0  ;;  %v1065_v3 = vmax.f32 %v919_v57, 0.0 }
 0x137   : > { %v1034_v4 = vmax.f32 %v794_v62, 0.0  ;;  %v1066_v5 = vmax.f32 %v922_v63, 0.0 }
 0x139   : > { %v1767_v6 = vpack.c.bf16 %v1034_v4, %v1033_v2  ;;  %v1847_v7 = vpack.c.bf16 %v1066_v5, %v1065_v3 }
 0x13a   : > { %v798_v8 = vpop.f32.mrb[12].mxu0  ;;  %v926_v9 = vpop.f32.mrb[12].mxu1 }
 0x13b   : > { %1915 = vst [vmem:[%s2468_s6 + $0x10] sm:$0xff] %v1767_v6   ;;  %1931 = vst [vmem:[%s2468_s6 + $0x90] sm:$0xff] %v1847_v7   ;;  %v799_v10 = vadd.f32 %v2459_v17, %v798_v8  ;;  %v927_v11 = vadd.f32 %v2459_v17, %v926_v9  ;;  %v800_v12 = vpop.f32.mrb[13].mxu0  ;;  %v928_v13 = vpop.f32.mrb[13].mxu1 }
 0x13c   : > { %v801_v14 = vpop.f32.mrb[14].mxu0  ;;  %v929_v15 = vpop.f32.mrb[14].mxu1 }
 0x13d   : > { %v802_v16 = vadd.f32 %v2459_v17, %v801_v14  ;;  %v930_v18 = vadd.f32 %v2459_v17, %v929_v15  ;;  %v803_v19 = vpop.f32.mrb[15].mxu0  ;;  %v931_v20 = vpop.f32.mrb[15].mxu1  ;;  %v1035_v21 = vmax.f32 %v799_v10, 0.0  ;;  %v1067_v22 = vmax.f32 %v927_v11, 0.0 }
 0x13f   : > { %v1036_v23 = vmax.f32 %v802_v16, 0.0  ;;  %v1068_v24 = vmax.f32 %v930_v18, 0.0 }
 0x141   : > { %v1772_v25 = vpack.c.bf16 %v1036_v23, %v1035_v21  ;;  %v1852_v26 = vpack.c.bf16 %v1068_v24, %v1067_v22 }
 0x142   : > { %v806_v27 = vpop.f32.mrb[16].mxu0  ;;  %v934_v28 = vpop.f32.mrb[16].mxu1 }
 0x143   : > { %1916 = vst [vmem:[%s2468_s6 + $0x18] sm:$0xff] %v1772_v25   ;;  %1932 = vst [vmem:[%s2468_s6 + $0x98] sm:$0xff] %v1852_v26   ;;  %v807_v29 = vadd.f32 %v2459_v17, %v806_v27  ;;  %v935_v30 = vadd.f32 %v2459_v17, %v934_v28  ;;  %v808_v31 = vpop.f32.mrb[17].mxu0  ;;  %v936_v32 = vpop.f32.mrb[17].mxu1 }
 0x144   : > { %v809_v33 = vpop.f32.mrb[18].mxu0  ;;  %v937_v34 = vpop.f32.mrb[18].mxu1 }
 0x145   : > { %v810_v35 = vadd.f32 %v2459_v17, %v809_v33  ;;  %v938_v36 = vadd.f32 %v2459_v17, %v937_v34  ;;  %v811_v37 = vpop.f32.mrb[19].mxu0  ;;  %v939_v38 = vpop.f32.mrb[19].mxu1  ;;  %v1037_v39 = vmax.f32 %v807_v29, 0.0  ;;  %v1069_v40 = vmax.f32 %v935_v30, 0.0 }
 0x147   : > { %v1038_v41 = vmax.f32 %v810_v35, 0.0  ;;  %v1070_v42 = vmax.f32 %v938_v36, 0.0 }
 0x149   : > { %v1777_v43 = vpack.c.bf16 %v1038_v41, %v1037_v39  ;;  %v1857_v44 = vpack.c.bf16 %v1070_v42, %v1069_v40 }
 0x14a   : > { %v814_v45 = vpop.f32.mrb[20].mxu0  ;;  %v942_v46 = vpop.f32.mrb[20].mxu1 }
 0x14b   : > { %1917 = vst [vmem:[%s2468_s6 + $0x20] sm:$0xff] %v1777_v43   ;;  %1933 = vst [vmem:[%s2468_s6 + $0xa0] sm:$0xff] %v1857_v44   ;;  %v815_v47 = vadd.f32 %v2459_v17, %v814_v45  ;;  %v943_v48 = vadd.f32 %v2459_v17, %v942_v46  ;;  %v816_v49 = vpop.f32.mrb[21].mxu0  ;;  %v944_v50 = vpop.f32.mrb[21].mxu1 }
 0x14c   : > { %v817_v51 = vpop.f32.mrb[22].mxu0  ;;  %v945_v52 = vpop.f32.mrb[22].mxu1 }
 0x14d   : > { %v818_v53 = vadd.f32 %v2459_v17, %v817_v51  ;;  %v946_v54 = vadd.f32 %v2459_v17, %v945_v52  ;;  %v819_v55 = vpop.f32.mrb[23].mxu0  ;;  %v947_v56 = vpop.f32.mrb[23].mxu1  ;;  %v1039_v57 = vmax.f32 %v815_v47, 0.0  ;;  %v1071_v58 = vmax.f32 %v943_v48, 0.0 }
 0x14f   : > { %v1040_v59 = vmax.f32 %v818_v53, 0.0  ;;  %v1072_v60 = vmax.f32 %v946_v54, 0.0 }
 0x151   : > { %v1782_v61 = vpack.c.bf16 %v1040_v59, %v1039_v57  ;;  %v1862_v62 = vpack.c.bf16 %v1072_v60, %v1071_v58 }
 0x152   : > { %v822_v63 = vpop.f32.mrb[24].mxu0  ;;  %v950_v0 = vpop.f32.mrb[24].mxu1 }
 0x153   : > { %1918 = vst [vmem:[%s2468_s6 + $0x28] sm:$0xff] %v1782_v61   ;;  %1934 = vst [vmem:[%s2468_s6 + $0xa8] sm:$0xff] %v1862_v62   ;;  %v823_v1 = vadd.f32 %v2459_v17, %v822_v63  ;;  %v951_v2 = vadd.f32 %v2459_v17, %v950_v0  ;;  %v824_v3 = vpop.f32.mrb[25].mxu0  ;;  %v952_v4 = vpop.f32.mrb[25].mxu1 }
 0x154   : > { %v825_v5 = vpop.f32.mrb[26].mxu0  ;;  %v953_v6 = vpop.f32.mrb[26].mxu1 }
 0x155   : > { %v826_v7 = vadd.f32 %v2459_v17, %v825_v5  ;;  %v954_v8 = vadd.f32 %v2459_v17, %v953_v6  ;;  %v827_v9 = vpop.f32.mrb[27].mxu0  ;;  %v955_v10 = vpop.f32.mrb[27].mxu1  ;;  %v1041_v11 = vmax.f32 %v823_v1, 0.0  ;;  %v1073_v12 = vmax.f32 %v951_v2, 0.0 }
 0x157   : > { %v1042_v13 = vmax.f32 %v826_v7, 0.0  ;;  %v1074_v14 = vmax.f32 %v954_v8, 0.0 }
 0x159   : > { %v1787_v15 = vpack.c.bf16 %v1042_v13, %v1041_v11  ;;  %v1867_v16 = vpack.c.bf16 %v1074_v14, %v1073_v12 }
 0x15a   : > { %v830_v18 = vpop.f32.mrb[28].mxu0  ;;  %v958_v19 = vpop.f32.mrb[28].mxu1 }
 0x15b   : > { %1919 = vst [vmem:[%s2468_s6 + $0x30] sm:$0xff] %v1787_v15   ;;  %1935 = vst [vmem:[%s2468_s6 + $0xb0] sm:$0xff] %v1867_v16   ;;  %v831_v20 = vadd.f32 %v2459_v17, %v830_v18  ;;  %v959_v21 = vadd.f32 %v2459_v17, %v958_v19  ;;  %v832_v22 = vpop.f32.mrb[29].mxu0  ;;  %v960_v23 = vpop.f32.mrb[29].mxu1 }
 0x15c   : > { %v833_v24 = vpop.f32.mrb[30].mxu0  ;;  %v961_v25 = vpop.f32.mrb[30].mxu1 }
 0x15d   : > { %v834_v26 = vadd.f32 %v2459_v17, %v833_v24  ;;  %v962_v27 = vadd.f32 %v2459_v17, %v961_v25  ;;  %v835_v28 = vpop.f32.mrb[31].mxu0  ;;  %v963_v29 = vpop.f32.mrb[31].mxu1  ;;  %v1043_v30 = vmax.f32 %v831_v20, 0.0  ;;  %v1075_v31 = vmax.f32 %v959_v21, 0.0 }
 0x15f   : > { %v1044_v32 = vmax.f32 %v834_v26, 0.0  ;;  %v1076_v33 = vmax.f32 %v962_v27, 0.0 }
 0x161   : > { %v1792_v34 = vpack.c.bf16 %v1044_v32, %v1043_v30  ;;  %v1872_v35 = vpack.c.bf16 %v1076_v33, %v1075_v31 }
 0x162   : > { %v838_v36 = vpop.f32.mrb[32].mxu0  ;;  %v966_v37 = vpop.f32.mrb[32].mxu1 }
 0x163   : > { %1920 = vst [vmem:[%s2468_s6 + $0x38] sm:$0xff] %v1792_v34   ;;  %1936 = vst [vmem:[%s2468_s6 + $0xb8] sm:$0xff] %v1872_v35   ;;  %v839_v38 = vadd.f32 %v2459_v17, %v838_v36  ;;  %v967_v39 = vadd.f32 %v2459_v17, %v966_v37  ;;  %v840_v40 = vpop.f32.mrb[33].mxu0  ;;  %v968_v41 = vpop.f32.mrb[33].mxu1 }
 0x164   : > { %v841_v42 = vpop.f32.mrb[34].mxu0  ;;  %v969_v43 = vpop.f32.mrb[34].mxu1 }
 0x165   : > { %v842_v44 = vadd.f32 %v2459_v17, %v841_v42  ;;  %v970_v45 = vadd.f32 %v2459_v17, %v969_v43  ;;  %v843_v46 = vpop.f32.mrb[35].mxu0  ;;  %v971_v47 = vpop.f32.mrb[35].mxu1  ;;  %v1045_v48 = vmax.f32 %v839_v38, 0.0  ;;  %v1077_v49 = vmax.f32 %v967_v39, 0.0 }
 0x167   : > { %v1046_v50 = vmax.f32 %v842_v44, 0.0  ;;  %v1078_v51 = vmax.f32 %v970_v45, 0.0 }
 0x169   : > { %v1797_v52 = vpack.c.bf16 %v1046_v50, %v1045_v48  ;;  %v1877_v53 = vpack.c.bf16 %v1078_v51, %v1077_v49 }
 0x16a   : > { %v846_v54 = vpop.f32.mrb[36].mxu0  ;;  %v974_v55 = vpop.f32.mrb[36].mxu1 }
 0x16b   : > { %1921 = vst [vmem:[%s2468_s6 + $0x40] sm:$0xff] %v1797_v52   ;;  %1937 = vst [vmem:[%s2468_s6 + $0xc0] sm:$0xff] %v1877_v53   ;;  %v847_v56 = vadd.f32 %v2459_v17, %v846_v54  ;;  %v975_v57 = vadd.f32 %v2459_v17, %v974_v55  ;;  %v848_v58 = vpop.f32.mrb[37].mxu0  ;;  %v976_v59 = vpop.f32.mrb[37].mxu1 }
 0x16c   : > { %v849_v60 = vpop.f32.mrb[38].mxu0  ;;  %v977_v61 = vpop.f32.mrb[38].mxu1 }
 0x16d   : > { %v850_v62 = vadd.f32 %v2459_v17, %v849_v60  ;;  %v978_v63 = vadd.f32 %v2459_v17, %v977_v61  ;;  %v851_v0 = vpop.f32.mrb[39].mxu0  ;;  %v979_v1 = vpop.f32.mrb[39].mxu1  ;;  %v1047_v2 = vmax.f32 %v847_v56, 0.0  ;;  %v1079_v3 = vmax.f32 %v975_v57, 0.0 }
 0x16f   : > { %v1048_v4 = vmax.f32 %v850_v62, 0.0  ;;  %v1080_v5 = vmax.f32 %v978_v63, 0.0 }
 0x171   : > { %v1802_v6 = vpack.c.bf16 %v1048_v4, %v1047_v2  ;;  %v1882_v7 = vpack.c.bf16 %v1080_v5, %v1079_v3 }
 0x172   : > { %v854_v8 = vpop.f32.mrb[40].mxu0  ;;  %v982_v9 = vpop.f32.mrb[40].mxu1 }
 0x173   : > { %1922 = vst [vmem:[%s2468_s6 + $0x48] sm:$0xff] %v1802_v6   ;;  %1938 = vst [vmem:[%s2468_s6 + $0xc8] sm:$0xff] %v1882_v7   ;;  %v855_v10 = vadd.f32 %v2459_v17, %v854_v8  ;;  %v983_v11 = vadd.f32 %v2459_v17, %v982_v9  ;;  %v856_v12 = vpop.f32.mrb[41].mxu0  ;;  %v984_v13 = vpop.f32.mrb[41].mxu1 }
 0x174   : > { %v857_v14 = vpop.f32.mrb[42].mxu0  ;;  %v985_v15 = vpop.f32.mrb[42].mxu1 }
 0x175   : > { %v858_v16 = vadd.f32 %v2459_v17, %v857_v14  ;;  %v986_v18 = vadd.f32 %v2459_v17, %v985_v15  ;;  %v859_v19 = vpop.f32.mrb[43].mxu0  ;;  %v987_v20 = vpop.f32.mrb[43].mxu1  ;;  %v1049_v21 = vmax.f32 %v855_v10, 0.0  ;;  %v1081_v22 = vmax.f32 %v983_v11, 0.0 }
 0x177   : > { %v1050_v23 = vmax.f32 %v858_v16, 0.0  ;;  %v1082_v24 = vmax.f32 %v986_v18, 0.0 }
 0x179   : > { %v1807_v25 = vpack.c.bf16 %v1050_v23, %v1049_v21  ;;  %v1887_v26 = vpack.c.bf16 %v1082_v24, %v1081_v22 }
 0x17a   : > { %v862_v27 = vpop.f32.mrb[44].mxu0  ;;  %v990_v28 = vpop.f32.mrb[44].mxu1 }
 0x17b   : > { %1923 = vst [vmem:[%s2468_s6 + $0x50] sm:$0xff] %v1807_v25   ;;  %1939 = vst [vmem:[%s2468_s6 + $0xd0] sm:$0xff] %v1887_v26   ;;  %v863_v29 = vadd.f32 %v2459_v17, %v862_v27  ;;  %v991_v30 = vadd.f32 %v2459_v17, %v990_v28  ;;  %v864_v31 = vpop.f32.mrb[45].mxu0  ;;  %v992_v32 = vpop.f32.mrb[45].mxu1 }
 0x17c   : > { %v865_v33 = vpop.f32.mrb[46].mxu0  ;;  %v993_v34 = vpop.f32.mrb[46].mxu1 }
 0x17d   : > { %v866_v35 = vadd.f32 %v2459_v17, %v865_v33  ;;  %v994_v36 = vadd.f32 %v2459_v17, %v993_v34  ;;  %v867_v37 = vpop.f32.mrb[47].mxu0  ;;  %v995_v38 = vpop.f32.mrb[47].mxu1  ;;  %v1051_v39 = vmax.f32 %v863_v29, 0.0  ;;  %v1083_v40 = vmax.f32 %v991_v30, 0.0 }
 0x17f   : > { %v1052_v41 = vmax.f32 %v866_v35, 0.0  ;;  %v1084_v42 = vmax.f32 %v994_v36, 0.0 }
 0x181   : > { %v1812_v43 = vpack.c.bf16 %v1052_v41, %v1051_v39  ;;  %v1892_v44 = vpack.c.bf16 %v1084_v42, %v1083_v40 }
 0x182   : > { %v870_v45 = vpop.f32.mrb[48].mxu0  ;;  %v998_v46 = vpop.f32.mrb[48].mxu1 }
 0x183   : > { %1924 = vst [vmem:[%s2468_s6 + $0x58] sm:$0xff] %v1812_v43   ;;  %1940 = vst [vmem:[%s2468_s6 + $0xd8] sm:$0xff] %v1892_v44   ;;  %v871_v47 = vadd.f32 %v2459_v17, %v870_v45  ;;  %v999_v48 = vadd.f32 %v2459_v17, %v998_v46  ;;  %v872_v49 = vpop.f32.mrb[49].mxu0  ;;  %v1000_v50 = vpop.f32.mrb[49].mxu1 }
 0x184   : > { %v873_v51 = vpop.f32.mrb[50].mxu0  ;;  %v1001_v52 = vpop.f32.mrb[50].mxu1 }
 0x185   : > { %v874_v53 = vadd.f32 %v2459_v17, %v873_v51  ;;  %v1002_v54 = vadd.f32 %v2459_v17, %v1001_v52  ;;  %v875_v55 = vpop.f32.mrb[51].mxu0  ;;  %v1003_v56 = vpop.f32.mrb[51].mxu1  ;;  %v1053_v57 = vmax.f32 %v871_v47, 0.0  ;;  %v1085_v58 = vmax.f32 %v999_v48, 0.0 }
 0x187   : > { %v1054_v59 = vmax.f32 %v874_v53, 0.0  ;;  %v1086_v60 = vmax.f32 %v1002_v54, 0.0 }
 0x189   : > { %v1817_v61 = vpack.c.bf16 %v1054_v59, %v1053_v57  ;;  %v1897_v62 = vpack.c.bf16 %v1086_v60, %v1085_v58 }
 0x18a   : > { %v878_v63 = vpop.f32.mrb[52].mxu0  ;;  %v1006_v0 = vpop.f32.mrb[52].mxu1 }
 0x18b   : > { %1925 = vst [vmem:[%s2468_s6 + $0x60] sm:$0xff] %v1817_v61   ;;  %1941 = vst [vmem:[%s2468_s6 + $0xe0] sm:$0xff] %v1897_v62   ;;  %v879_v1 = vadd.f32 %v2459_v17, %v878_v63  ;;  %v1007_v2 = vadd.f32 %v2459_v17, %v1006_v0  ;;  %v880_v3 = vpop.f32.mrb[53].mxu0  ;;  %v1008_v4 = vpop.f32.mrb[53].mxu1 }
 0x18c   : > { %v881_v5 = vpop.f32.mrb[54].mxu0  ;;  %v1009_v6 = vpop.f32.mrb[54].mxu1 }
 0x18d   : > { %v882_v7 = vadd.f32 %v2459_v17, %v881_v5  ;;  %v1010_v8 = vadd.f32 %v2459_v17, %v1009_v6  ;;  %v883_v9 = vpop.f32.mrb[55].mxu0  ;;  %v1011_v10 = vpop.f32.mrb[55].mxu1  ;;  %v1055_v11 = vmax.f32 %v879_v1, 0.0  ;;  %v1087_v12 = vmax.f32 %v1007_v2, 0.0 }
 0x18f   : > { %v1056_v13 = vmax.f32 %v882_v7, 0.0  ;;  %v1088_v14 = vmax.f32 %v1010_v8, 0.0 }
 0x191   : > { %v1822_v15 = vpack.c.bf16 %v1056_v13, %v1055_v11  ;;  %v1902_v16 = vpack.c.bf16 %v1088_v14, %v1087_v12 }
 0x192   : > { %v886_v18 = vpop.f32.mrb[56].mxu0  ;;  %v1014_v19 = vpop.f32.mrb[56].mxu1 }
 0x193   : > { %1926 = vst [vmem:[%s2468_s6 + $0x68] sm:$0xff] %v1822_v15   ;;  %1942 = vst [vmem:[%s2468_s6 + $0xe8] sm:$0xff] %v1902_v16   ;;  %v887_v20 = vadd.f32 %v2459_v17, %v886_v18  ;;  %v1015_v21 = vadd.f32 %v2459_v17, %v1014_v19  ;;  %v888_v22 = vpop.f32.mrb[57].mxu0  ;;  %v1016_v23 = vpop.f32.mrb[57].mxu1 }
 0x194   : > { %v889_v24 = vpop.f32.mrb[58].mxu0  ;;  %v1017_v25 = vpop.f32.mrb[58].mxu1 }
 0x195   : > { %v890_v26 = vadd.f32 %v2459_v17, %v889_v24  ;;  %v1018_v27 = vadd.f32 %v2459_v17, %v1017_v25  ;;  %v891_v28 = vpop.f32.mrb[59].mxu0  ;;  %v1019_v29 = vpop.f32.mrb[59].mxu1  ;;  %v1057_v30 = vmax.f32 %v887_v20, 0.0  ;;  %v1089_v31 = vmax.f32 %v1015_v21, 0.0 }
 0x197   : > { %v1058_v32 = vmax.f32 %v890_v26, 0.0  ;;  %v1090_v33 = vmax.f32 %v1018_v27, 0.0 }
 0x199   : > { %v1827_v34 = vpack.c.bf16 %v1058_v32, %v1057_v30  ;;  %v1907_v35 = vpack.c.bf16 %v1090_v33, %v1089_v31 }
 0x19a   : > { %v894_v36 = vpop.f32.mrb[60].mxu0  ;;  %v1022_v37 = vpop.f32.mrb[60].mxu1 }
 0x19b   : > { %1927 = vst [vmem:[%s2468_s6 + $0x70] sm:$0xff] %v1827_v34   ;;  %1943 = vst [vmem:[%s2468_s6 + $0xf0] sm:$0xff] %v1907_v35   ;;  %v895_v38 = vadd.f32 %v2459_v17, %v894_v36  ;;  %v1023_v39 = vadd.f32 %v2459_v17, %v1022_v37  ;;  %v896_v40 = vpop.f32.mrb[61].mxu0  ;;  %v1024_v41 = vpop.f32.mrb[61].mxu1 }
 0x19c   : > { %v897_v42 = vpop.f32.mrb[62].mxu0  ;;  %v1025_v43 = vpop.f32.mrb[62].mxu1 }
 0x19d   : > { %v898_v44 = vadd.f32 %v2459_v17, %v897_v42  ;;  %v1026_v45 = vadd.f32 %v2459_v17, %v1025_v43  ;;  %v899_v46 = vpop.f32.mrb[63].mxu0  ;;  %v1027_v47 = vpop.f32.mrb[63].mxu1  ;;  %v1059_v48 = vmax.f32 %v895_v38, 0.0  ;;  %v1091_v49 = vmax.f32 %v1023_v39, 0.0 }
 0x19f   : > { %v1060_v50 = vmax.f32 %v898_v44, 0.0  ;;  %v1092_v51 = vmax.f32 %v1026_v45, 0.0 }
 0x1a1   : > { %v1832_v17 = vpack.c.bf16 %v1060_v50, %v1059_v48  ;;  %v1912_v52 = vpack.c.bf16 %v1092_v51, %v1091_v49 }
 0x1a3   : > { %1928 = vst [vmem:[%s2468_s6 + $0x78] sm:$0xff] %v1832_v17   ;;  %1944 = vst [vmem:[%s2468_s6 + $0xf8] sm:$0xff] %v1912_v52  }
 0x1a4   : > { %2160 = shalt.err (!%p2157_p5)
}
 0x1a5   : > { %s2161_s27 = scalar_lea.hbm %s2565_s11, 4096  ;;  %s2165_s30 = scalar_lea.hbm %s2622_s3, 16384 }
 0x1a6   : > { %p2162_p6 = scmp.ne.s32.totalorder %s2565_s11, %s2161_s27  ;;  %p2166_p10 = scmp.lt.u32.totalorder %s2565_s11, %s2622_s3 }
 0x1a7   : > { %p2167_p11 = scmp.lt.u32.totalorder %s2165_s30, %s2161_s27  ;;  %p2169_p13 = scmp.lt.u32.totalorder %s2161_s27, %s2565_s11 }
 0x1a8   : > { %p2163_p7 = pnand %p2162_p6, %p2291_p4 }
 0x1a9   : > { %p2168_p12 = por %p2167_p11, %p2166_p10 }
 0x1aa   : > { %p2164_p9 = pneg %p2163_p7 }
 0x1ab   : > { %p2170_p0 = por %p2169_p13, %p2168_p12 }
 0x1ad   : > { %p2171_p1 = pnand %p2170_p0, %p2164_p9 }
 0x1af   : > { %2174 = shalt.err (!%p2171_p1)
}
 0x1b0   : > { %s2229_s19 = smov 64   ;;  %s2230_s6 = smov 4  }
 0x1b1   : > { %1977 = dma.vmem_to_hbm [thread:$0]  (%p2291_p4), %s2567_s8, 4096, %s2565_s11, %s2573_s15, %s2229_s19, %s2229_s19, %s2230_s6  }
 0x1b2 PF: > { %p1983_p2 = scmp.ge.s32.totalorder %s2225_s17, 2  ;;  %s1443_s7 = sand.u32 1, %s2205_s12  }
 0x1b3   : > { %s1444_s9 = scalar_lea.sflag [#allocation3], %s1443_s7 }
 0x1b4   : > { %p1980_p3 = pnand %p1983_p2, %p2298_p8 }
 0x1b6   : > { %2200 = dma.done.wait (!%p1980_p3), %s1444_s9, 4096  }
 0x1b7   : > { %2202 = vsyncadd (!%p1980_p3), %s1444_s9, 4294963200  ;;  %s16_s17 = sadd.s32 1, %s2225_s17   ;;  %s2625_s12 = smov %s2209_s13 }
 0x1b8   : > { %p13_p5 = scmp.ge.s32.totalorder %s16_s17, 6   ;;  %s2626_s13 = smov %s2213_s14 }
 0x1b9   : > { %s2627_s14 = smov %s2304_s25  ;;  %s2628_s15 = smov %s2221_s16 }
 0x1ba   : > { %s2629_s16 = smov %s2631_s20  ;;  %15 = sbr.rel (!%p13_p5) target bundleno = 4 (0x4), region = 73 }
 0x1c1   :  { %1449 = vsyncpa [#allocation3], 1 }
 0x1c2   :  { %1451 = vsyncpa [#allocation3 + $0x1], 1 }

</bundles_post_ra>
